<compile_context>
chip_gen: v6e
topology: v6e:2x2x1
jax: 0.10.0
libtpu: 0.0.40
codegen_flags: <defaults>
</compile_context>

<pallas_src>
import jax
import jax.numpy as jnp
import numpy as np
from jax.experimental import pallas as pl
from jax.experimental.pallas import tpu as pltpu

_LANE = 128
_BYPASS_BYTES = 256 * 1024          # below this, plain XLA is strictly better
_MAX_BATCH_TILE = 1024              # ~85% of HBM roofline reached by ~512 rows


def _round_up(x, m):
    return ((x + m - 1) // m) * m


def _nbytes(a):
    return int(a.size) * jnp.dtype(a.dtype).itemsize


def _sublane(dtype):
    """Packed sublane count: 8 for 32-bit, 16 for 16-bit, 32 for 8-bit."""
    size = jnp.dtype(dtype).itemsize
    if size >= 4:
        return 8
    if size == 2:
        return 16
    return 32


def _tpu_config():
    """Returns (vmem_budget_bytes, vmem_limit_bytes, min_batch_splits)."""
    kind = ""
    try:
        kind = jax.devices()[0].device_kind.lower()
    except Exception:
        pass
    if "v5" in kind:
        budget = 14 * 1024 * 1024        # v5e scoped-VMEM default is 16 MiB
    else:
        budget = 24 * 1024 * 1024        # v6e / v7x (32 MiB scoped default)
    try:                                  # never exceed physical VMEM (v7x: 64 MiB)
        phys = int(pltpu.get_tpu_info().vmem_capacity_bytes)
        budget = min(budget, phys // 2)
    except Exception:
        pass
    limit = budget + 4 * 1024 * 1024
    # v7x has 2 TensorCores per chip: force >=2 "parallel" batch steps there.
    splits = 2 if "v7" in kind else 1
    return budget, limit, splits


# ----------------------------------------------------------------------------
# Kernels
# ----------------------------------------------------------------------------
def _add_kernel(x_ref, s_ref, o_ref):
    o_ref[...] = x_ref[...] + s_ref[...]


def _make_concat_kernel(c1):
    """Single feature block per operand: x -> out[:, :c1], s -> out[:, c1:]."""
    def kernel(x_ref, s_ref, o_ref):
        o_ref[:, :c1] = x_ref[...]
        o_ref[:, c1:] = s_ref[...]
    return kernel


def _make_concat_kernel_tiled(nf_x):
    """Feature-tiled concat: the first nf_x feature blocks of the output come
    from x, the remaining ones from s (split point is block-aligned)."""
    def kernel(x_ref, s_ref, o_ref):
        j = pl.program_id(1)

        @pl.when(j < nf_x)
        def _():
            o_ref[...] = x_ref[...]

        @pl.when(j >= nf_x)
        def _():
            o_ref[...] = s_ref[...]
    return kernel


# ----------------------------------------------------------------------------
# pallas_call wrappers
# ----------------------------------------------------------------------------
def _pallas_add(x, s, *, vmem_budget=None):
    """x, s: (B, C), same shape & dtype.  Always takes the Pallas path."""
    b, c = x.shape
    itemsize = jnp.dtype(x.dtype).itemsize
    budget, limit, splits = _tpu_config()
    if vmem_budget is not None:
        budget = vmem_budget
    sub = _sublane(x.dtype)

    per_row = 2 * 3 * c * itemsize            # x + s + out, double buffered
    max_rows = budget // max(1, per_row)

    if b <= max_rows:                          # whole batch fits in one block
        tb, tc = b, c
        if splits > 1 and b >= splits * sub:   # keep both v7x TCs streaming
            tb = _round_up(-(-b // splits), sub)
    elif max_rows >= sub:                      # batch tiling only, lane-dense C
        tb, tc = min(_MAX_BATCH_TILE, (max_rows // sub) * sub), c
    else:                                      # fat rows: tile the feature axis
        max_cols = budget // max(1, 2 * 3 * sub * itemsize)
        tc = max(_LANE, min(8192, (max_cols // _LANE) * _LANE))
        tc = min(tc, c)
        rows = budget // max(1, 2 * 3 * tc * itemsize)
        tb = min(_MAX_BATCH_TILE, max(sub, (rows // sub) * sub))
        tb = min(tb, b)

    grid = (pl.cdiv(b, tb), pl.cdiv(c, tc))
    spec = pl.BlockSpec((tb, tc), lambda i, j: (i, j))
    return pl.pallas_call(
        _add_kernel,
        out_shape=jax.ShapeDtypeStruct((b, c), x.dtype),
        grid_spec=pltpu.PrefetchScalarGridSpec(
            num_scalar_prefetch=0,
            grid=grid,
            in_specs=[spec, spec],
            out_specs=spec,
        ),
        compiler_params=pltpu.CompilerParams(
            dimension_semantics=("parallel", "parallel"),
            vmem_limit_bytes=int(limit)),
    )(x, s)


def _pallas_concat(x, s, *, vmem_budget=None):
    """x: (B, C1), s: (B, C2) -> (B, C1 + C2).  Falls back to XLA concat when
    the split point is lane-misaligned or no VMEM-safe tiling exists."""
    b, c1 = x.shape
    _, c2 = s.shape
    c_out = c1 + c2
    itemsize = jnp.dtype(x.dtype).itemsize
    budget, limit, splits = _tpu_config()
    if vmem_budget is not None:
        budget = vmem_budget
    sub = _sublane(x.dtype)

    if c1 % _LANE != 0:
        # Misaligned split point -> masked vst + lane rotation on every row;
        # a plain XLA concat is better and fuses with neighbours.
        return jnp.concatenate([x, s], axis=1)

    per_row = 2 * 2 * c_out * itemsize         # (x + s) + out, double buffered
    max_rows = budget // max(1, per_row)

    if b <= max_rows or max_rows >= sub:
        # Single feature block per operand; batch tiling only.
        if b <= max_rows:
            tb = b
            if splits > 1 and b >= splits * sub:
                tb = _round_up(-(-b // splits), sub)
        else:
            tb = min(_MAX_BATCH_TILE, (max_rows // sub) * sub)
        grid = (pl.cdiv(b, tb),)
        return pl.pallas_call(
            _make_concat_kernel(c1),
            out_shape=jax.ShapeDtypeStruct((b, c_out), x.dtype),
            grid_spec=pltpu.PrefetchScalarGridSpec(
                num_scalar_prefetch=0,
                grid=grid,
                in_specs=[pl.BlockSpec((tb, c1), lambda i: (i, 0)),
                          pl.BlockSpec((tb, c2), lambda i: (i, 0))],
                out_specs=pl.BlockSpec((tb, c_out), lambda i: (i, 0)),
            ),
            compiler_params=pltpu.CompilerParams(
                dimension_semantics=("parallel",),
                vmem_limit_bytes=int(limit)),
        )(x, s)

    # Fat rows: 2-D (batch, feature) tiling.  The feature tile must divide C1
    # so that no output block straddles the concat split point.
    max_tf = budget // max(1, 2 * 3 * sub * itemsize)
    max_tf = min(8192, (max_tf // _LANE) * _LANE)
    if max_tf < _LANE:
        # TODO(synk): a descriptor-driven HBM->HBM DMA concat (memory_space=
        # pl.ANY + make_async_copy into column slices) would avoid the VMEM
        # round-trip entirely; fall back to XLA for this corner.
        return jnp.concatenate([x, s], axis=1)
    n128 = c1 // _LANE
    tf = _LANE
    for k in range(min(n128, max_tf // _LANE), 0, -1):
        if n128 % k == 0:
            tf = k * _LANE
            break
    rows = budget // max(1, 2 * 3 * tf * itemsize)
    tb = min(_MAX_BATCH_TILE, max(sub, (rows // sub) * sub))
    tb = min(tb, b)

    nf_x = c1 // tf
    nf_s = pl.cdiv(c2, tf)
    grid = (pl.cdiv(b, tb), nf_x + nf_s)
    x_spec = pl.BlockSpec((tb, tf), lambda i, j: (i, jnp.minimum(j, nf_x - 1)))
    s_spec = pl.BlockSpec((tb, tf), lambda i, j: (i, jnp.maximum(j - nf_x, 0)))
    o_spec = pl.BlockSpec((tb, tf), lambda i, j: (i, j))
    return pl.pallas_call(
        _make_concat_kernel_tiled(nf_x),
        out_shape=jax.ShapeDtypeStruct((b, c_out), x.dtype),
        grid_spec=pltpu.PrefetchScalarGridSpec(
            num_scalar_prefetch=0,
            grid=grid,
            in_specs=[x_spec, s_spec],
            out_specs=o_spec,
        ),
        compiler_params=pltpu.CompilerParams(
            dimension_semantics=("parallel", "parallel"),
            vmem_limit_bytes=int(limit)),
    )(x, s)


# ----------------------------------------------------------------------------
# Dispatchers (tiny-input bypass + rank handling)
# ----------------------------------------------------------------------------
def memory_add(x, s):
    """input + stored (shapes/dtypes must match), any rank."""
    assert x.shape == s.shape and x.dtype == s.dtype
    if 3 * _nbytes(x) < _BYPASS_BYTES or x.ndim < 2:
        return x + s                      # tiny: let XLA fuse it
    b = x.shape[0]
    out = _pallas_add(x.reshape(b, -1), s.reshape(b, -1))
    return out.reshape(x.shape)


def memory_concat(x, s):
    """cat([x, s], dim=1), any rank >= 2 (trailing dims must match)."""
    assert x.dtype == s.dtype
    assert x.ndim == s.ndim and x.ndim >= 2
    assert x.shape[0] == s.shape[0] and x.shape[2:] == s.shape[2:]
    out_shape = (x.shape[0], x.shape[1] + s.shape[1]) + x.shape[2:]
    if 2 * (_nbytes(x) + _nbytes(s)) < _BYPASS_BYTES:
        return jnp.concatenate([x, s], axis=1)
    b = x.shape[0]
    # cat along dim 1 of row-major tensors == cat of their (B, -1) views.
    out = _pallas_concat(x.reshape(b, -1), s.reshape(b, -1))
    return out.reshape(out_shape)


# ----------------------------------------------------------------------------
# MemoryLayer
# ----------------------------------------------------------------------------
class MemoryLayer:
    """Skip-connection helper mirroring the PyTorch module's forward().

    NOTE: like the PyTorch original, `storage` is class-level Python state
    keyed only by `id`; store/read must happen at the Python level (the
    side effect is not jax.jit-safe), and every instance shares the dict.
    """

    storage = {}

    def __init__(self, id, output=False, add=False):
        self.id = id
        self.output = output
        self.add = add

    def __call__(self, input):
        if not self.output:
            MemoryLayer.storage[self.id] = input
            return input
        if self.id not in MemoryLayer.storage:
            raise ValueError(
                "MemoryLayer: id '%s' is not initialized. You must execute "
                "MemoryLayer with the same id and output=False before this "
                "layer." % self.id)
        stored = MemoryLayer.storage[self.id]
        if self.add:
            return memory_add(input, stored)
        return memory_concat(input, stored)


# ----------------------------------------------------------------------------
# Test
# ----------------------------------------------------------------------------
if __name__ == "__main__":
    def check(actual, expected, name):
        np.testing.assert_allclose(np.asarray(actual), expected,
                                   rtol=1e-6, atol=1e-6, err_msg=name)

    keys = jax.random.split(jax.random.PRNGKey(0), 8)

    # ---- Direct Pallas paths ------------------------------------------------
    # (a) batch-tiled add / concat (default, generation-aware budget).
    xa = jax.random.normal(keys[0], (64, 384), jnp.float32)
    sa = jax.random.normal(keys[1], (64, 384), jnp.float32)
    check(jax.block_until_ready(_pallas_add(xa, sa)),
          np.asarray(xa) + np.asarray(sa), "add/batch-tiled")

    xc = jax.random.normal(keys[2], (64, 256), jnp.float32)
    sc = jax.random.normal(keys[3], (64, 384), jnp.float32)
    check(jax.block_until_ready(_pallas_concat(xc, sc)),
          np.concatenate([np.asarray(xc), np.asarray(sc)], axis=1),
          "concat/batch-tiled")

    # (b) feature-tiled paths (tiny forced VMEM budget exercises the 2-D grid).
    xf = jax.random.normal(keys[4], (12, 576), jnp.float32)
    sf = jax.random.normal(keys[5], (12, 576), jnp.float32)
    check(jax.block_until_ready(_pallas_add(xf, sf, vmem_budget=64 * 1024)),
          np.asarray(xf) + np.asarray(sf), "add/feature-tiled")

    xg = jax.random.normal(keys[6], (16, 256), jnp.float32)
    sg = jax.random.normal(keys[7], (16, 320), jnp.float32)
    check(jax.block_until_ready(_pallas_concat(xg, sg, vmem_budget=32 * 1024)),
          np.concatenate([np.asarray(xg), np.asarray(sg)], axis=1),
          "concat/feature-tiled")

    # (c) lane-misaligned split point -> clean XLA fallback.
    xm = xg[:, :200]
    check(jax.block_until_ready(_pallas_concat(xm, sg)),
          np.concatenate([np.asarray(xm), np.asarray(sg)], axis=1),
          "concat/misaligned-fallback")

    # ---- MemoryLayer end-to-end ----------------------------------------------
    # MLP-style skip connection (small shapes; takes the fused-XLA bypass).
    k1, k2, k3 = jax.random.split(jax.random.PRNGKey(1), 3)
    h = jax.random.normal(k1, (2, 32), jnp.float32)
    a = jax.random.normal(k2, (2, 32), jnp.float32)
    c = jax.random.normal(k3, (2, 24), jnp.float32)

    store = MemoryLayer("#1")
    add_layer = MemoryLayer("#1", output=True, add=True)
    cat_layer = MemoryLayer("#1", output=True, add=False)

    y = store(h)
    check(y, np.asarray(h), "store/identity")
    check(jax.block_until_ready(add_layer(a)),
          np.asarray(a) + np.asarray(h), "layer/add")
    check(jax.block_until_ready(cat_layer(c)),
          np.concatenate([np.asarray(c), np.asarray(h)], axis=1), "layer/cat")

    # Conv-style (rank-4) skip connection: concat along the channel dim.
    k4, k5 = jax.random.split(jax.random.PRNGKey(2), 2)
    fmap = jax.random.normal(k4, (2, 4, 16, 16), jnp.float32)
    fin = jax.random.normal(k5, (2, 2, 16, 16), jnp.float32)
    MemoryLayer("#conv")(fmap)
    out4 = jax.block_until_ready(
        MemoryLayer("#conv", output=True, add=False)(fin))
    check(out4, np.concatenate([np.asarray(fin), np.asarray(fmap)], axis=1),
          "layer/cat-rank4")
    out4a = jax.block_until_ready(
        MemoryLayer("#conv", output=True, add=True)(fmap))
    check(out4a, np.asarray(fmap) * 2, "layer/add-rank4")

    # Error path: uninitialized id must raise, like the PyTorch module.
    try:
        MemoryLayer("#missing", output=True)(h)
        raise AssertionError("expected ValueError for uninitialized id")
    except ValueError:
        pass

    print("KERNEL_OK")
</pallas_src>

<mosaic_0001>
module attributes {stable_mosaic.version = 11 : i64} {
  func.func @_add_kernel(%arg0: i32, %arg1: i32, %arg2: memref<64x384xf32, #tpu.memory_space<vmem>>, %arg3: memref<64x384xf32, #tpu.memory_space<vmem>>, %arg4: memref<64x384xf32, #tpu.memory_space<vmem>>) attributes {dimension_semantics = [#tpu.dimension_semantics<parallel>, #tpu.dimension_semantics<parallel>], iteration_bounds = array<i64: 1, 1>, scalar_prefetch = 0 : i64, scratch_operands = 0 : i64, tpu.core_type = #tpu.core_type<tc>, window_params = [{transform_indices = @transform_0, window_bounds = array<i64: 64, 384>}, {transform_indices = @transform_1, window_bounds = array<i64: 64, 384>}, {transform_indices = @transform_2, window_bounds = array<i64: 64, 384>}]} {
    %c0 = arith.constant 0 : index
    %c0_0 = arith.constant 0 : index
    %0 = vector.load %arg2[%c0, %c0_0] : memref<64x384xf32, #tpu.memory_space<vmem>>, vector<64x384xf32>
    %c0_1 = arith.constant 0 : index
    %c0_2 = arith.constant 0 : index
    %1 = vector.load %arg3[%c0_1, %c0_2] : memref<64x384xf32, #tpu.memory_space<vmem>>, vector<64x384xf32>
    %2 = arith.addf %0, %1 : vector<64x384xf32>
    %c0_3 = arith.constant 0 : index
    %c0_4 = arith.constant 0 : index
    %3 = vector.load %arg4[%c0_3, %c0_4] : memref<64x384xf32, #tpu.memory_space<vmem>>, vector<64x384xf32>
    tpu.vector_store %arg4[%c0_3, %c0_4], %2 {strides = array<i32>} : memref<64x384xf32, #tpu.memory_space<vmem>>, vector<64x384xf32>,
    return
  }
  func.func @transform_0(%arg0: i32, %arg1: i32) -> (i32, i32) {
    %c0_i32 = arith.constant 0 : i32
    return %arg0, %arg1 : i32, i32
  }
  func.func @transform_1(%arg0: i32, %arg1: i32) -> (i32, i32) {
    %c0_i32 = arith.constant 0 : i32
    return %arg0, %arg1 : i32, i32
  }
  func.func @transform_2(%arg0: i32, %arg1: i32) -> (i32, i32) {
    %c0_i32 = arith.constant 0 : i32
    return %arg0, %arg1 : i32, i32
  }
}

</mosaic_0001>

<bundles_post_ra>
// kernel: tpu_custom_call.1
= control target key start
LH: loop header
LB: loop body
LE: loop exit
PB: predicated region body
PF: predicated region fallthrough
CT: control target
= control target key end

     0   :  { %7 = vsyncpa [#allocation3], 0  ;;  %s263_s0 = inlined_call_operand.hbm [shape: f32[64,384], index: 0, kind: input, shape index: {}]   ;;  %s264_s1 = inlined_call_operand.hbm [shape: f32[64,384], index: 1, kind: input, shape index: {}]   ;;  %s265_s2 = inlined_call_operand.hbm [shape: f32[64,384], index: 2, kind: output, shape index: {}]  }
   0x1   :  { %8 = vsyncpa [#allocation6], 0 }
   0x2   :  { %9 = vsyncpa [#allocation4], 0  ;;  %s225_s9 = smov [#allocation2]  }
   0x3   :  { %s15_s10 = sshll.u32 %s225_s9, 4  ;;  %s16_s10 = int_to_ptr.vmem [resolvable:$true] %s15_s10 }
   0x4   :  { %s167_s11 = scalar_lea.vmem %s16_s10, 3072  ;;  %p172_p1 = scmp.lt.s32.totalorder %s16_s10, %s16_s10 }
   0x5   :  { %p168_p0 = scmp.ne.s32.totalorder %s16_s10, %s167_s11  ;;  %p173_p2 = scmp.lt.s32.totalorder %s167_s11, %s167_s11 }
   0x7   :  { %p174_p3 = por %p173_p2, %p172_p1 }
   0x9   :  { %p175_p4 = pnand %p174_p3, %p168_p0 }
   0xb   :  { %178 = shalt.err (!%p175_p4)
}
   0xc   :  { %s226_s12 = smov 384   ;;  %s227_s13 = smov 24  }
   0xd   :  { %21 = dma.hbm_to_vmem [thread:$0]  %s263_s0, 3072, %s16_s10, [#allocation3], %s226_s12, %s226_s12, %s227_s13  }
   0xe   :  { %s228_s16 = smov [#allocation5]  }
   0xf   :  { %s27_s17 = sshll.u32 %s228_s16, 4  ;;  %s28_s17 = int_to_ptr.vmem [resolvable:$true] %s27_s17 }
  0x10   :  { %s187_s18 = scalar_lea.vmem %s28_s17, 3072  ;;  %p192_p6 = scmp.lt.s32.totalorder %s28_s17, %s28_s17 }
  0x11   :  { %p188_p5 = scmp.ne.s32.totalorder %s28_s17, %s187_s18  ;;  %p193_p7 = scmp.lt.s32.totalorder %s187_s18, %s187_s18 }
  0x13   :  { %p194_p8 = por %p193_p7, %p192_p6 }
  0x15   :  { %p195_p9 = pnand %p194_p8, %p188_p5 }
  0x17   :  { %198 = shalt.err (!%p195_p9)
}
  0x18   :  { %33 = dma.hbm_to_vmem [thread:$0]  %s264_s1, 3072, %s28_s17, [#allocation6], %s226_s12, %s226_s12, %s227_s13  }
  0x19   :  { %219 = dma.done.wait [#allocation3], 3072  }
  0x1a   :  { %220 = vsyncadd [#allocation3], 4294964224 }
  0x1b   :  { %221 = dma.done.wait [#allocation6], 3072  }
  0x1c   :  { %222 = vsyncadd [#allocation6], 4294964224  ;;  %v40_v0 = vld [vmem:[#allocation2] sm:$0xff]  ;;  %v41_v2 = vld [vmem:[#allocation2 + $0x8] sm:$0xff]  ;;  %s229_s0 = smov [#allocation7]  }
  0x1d   :  { %v64_v1 = vld [vmem:[#allocation5] sm:$0xff]  ;;  %v65_v4 = vld [vmem:[#allocation5 + $0x8] sm:$0xff]  ;;  %v42_v5 = vld [vmem:[#allocation2 + $0x10] sm:$0xff]  ;;  %s141_s1 = sshll.u32 %s229_s0, 4  ;;  %s142_s1 = int_to_ptr.vmem [resolvable:$true] %s141_s1 }
  0x1e   :  { %v88_v3 = vadd.f32 %v64_v1, %v40_v0  ;;  %v66_v6 = vld [vmem:[#allocation5 + $0x10] sm:$0xff]  ;;  %v89_v7 = vadd.f32 %v65_v4, %v41_v2  ;;  %v43_v9 = vld [vmem:[#allocation2 + $0x18] sm:$0xff]  ;;  %v44_v11 = vld [vmem:[#allocation2 + $0x20] sm:$0xff]  ;;  %s199_s21 = scalar_lea.vmem %s142_s1, 3072  ;;  %p204_p11 = scmp.lt.s32.totalorder %s142_s1, %s142_s1 }
  0x1f   :  { %v90_v8 = vadd.f32 %v66_v6, %v42_v5  ;;  %v67_v10 = vld [vmem:[#allocation5 + $0x18] sm:$0xff]  ;;  %v68_v13 = vld [vmem:[#allocation5 + $0x20] sm:$0xff]  ;;  %v45_v14 = vld [vmem:[#allocation2 + $0x28] sm:$0xff]  ;;  %p200_p10 = scmp.ne.s32.totalorder %s142_s1, %s199_s21  ;;  %p205_p12 = scmp.lt.s32.totalorder %s199_s21, %s199_s21 }
  0x20   :  { %112 = vst [vmem:[#allocation7] sm:$0xff] %v88_v3  ;;  %v91_v12 = vadd.f32 %v67_v10, %v43_v9  ;;  %v69_v15 = vld [vmem:[#allocation5 + $0x28] sm:$0xff]  ;;  %113 = vst [vmem:[#allocation7 + $0x8] sm:$0xff] %v89_v7  ;;  %v92_v16 = vadd.f32 %v68_v13, %v44_v11  ;;  %v46_v18 = vld [vmem:[#allocation2 + $0x30] sm:$0xff] }
  0x21   :  { %114 = vst [vmem:[#allocation7 + $0x10] sm:$0xff] %v90_v8  ;;  %v93_v17 = vadd.f32 %v69_v15, %v45_v14  ;;  %v70_v19 = vld [vmem:[#allocation5 + $0x30] sm:$0xff]  ;;  %v47_v20 = vld [vmem:[#allocation2 + $0x38] sm:$0xff]  ;;  %v48_v23 = vld [vmem:[#allocation2 + $0x40] sm:$0xff]  ;;  %p206_p13 = por %p205_p12, %p204_p11 }
  0x22   :  { %115 = vst [vmem:[#allocation7 + $0x18] sm:$0xff] %v91_v12  ;;  %v94_v21 = vadd.f32 %v70_v19, %v46_v18  ;;  %v71_v22 = vld [vmem:[#allocation5 + $0x38] sm:$0xff]  ;;  %v72_v24 = vld [vmem:[#allocation5 + $0x40] sm:$0xff]  ;;  %116 = vst [vmem:[#allocation7 + $0x20] sm:$0xff] %v92_v16 }
  0x23   :  { %117 = vst [vmem:[#allocation7 + $0x28] sm:$0xff] %v93_v17  ;;  %v95_v25 = vadd.f32 %v71_v22, %v47_v20  ;;  %v96_v26 = vadd.f32 %v72_v24, %v48_v23  ;;  %v49_v27 = vld [vmem:[#allocation2 + $0x48] sm:$0xff]  ;;  %v50_v29 = vld [vmem:[#allocation2 + $0x50] sm:$0xff]  ;;  %v51_v32 = vld [vmem:[#allocation2 + $0x58] sm:$0xff]  ;;  %p207_p0 = pnand %p206_p13, %p200_p10 }
  0x24   :  { %v73_v28 = vld [vmem:[#allocation5 + $0x48] sm:$0xff]  ;;  %118 = vst [vmem:[#allocation7 + $0x30] sm:$0xff] %v94_v21  ;;  %v74_v31 = vld [vmem:[#allocation5 + $0x50] sm:$0xff]  ;;  %v75_v33 = vld [vmem:[#allocation5 + $0x58] sm:$0xff] }
  0x25   :  { %v97_v30 = vadd.f32 %v73_v28, %v49_v27  ;;  %119 = vst [vmem:[#allocation7 + $0x38] sm:$0xff] %v95_v25  ;;  %120 = vst [vmem:[#allocation7 + $0x40] sm:$0xff] %v96_v26  ;;  %v98_v34 = vadd.f32 %v74_v31, %v50_v29  ;;  %v99_v35 = vadd.f32 %v75_v33, %v51_v32  ;;  %v52_v36 = vld [vmem:[#allocation2 + $0x60] sm:$0xff]  ;;  %v53_v38 = vld [vmem:[#allocation2 + $0x68] sm:$0xff] }
  0x26   :  { %v76_v37 = vld [vmem:[#allocation5 + $0x60] sm:$0xff]  ;;  %v77_v40 = vld [vmem:[#allocation5 + $0x68] sm:$0xff]  ;;  %v54_v41 = vld [vmem:[#allocation2 + $0x70] sm:$0xff] }
  0x27   :  { %121 = vst [vmem:[#allocation7 + $0x48] sm:$0xff] %v97_v30  ;;  %v100_v39 = vadd.f32 %v76_v37, %v52_v36  ;;  %v78_v42 = vld [vmem:[#allocation5 + $0x70] sm:$0xff]  ;;  %122 = vst [vmem:[#allocation7 + $0x50] sm:$0xff] %v98_v34  ;;  %v101_v43 = vadd.f32 %v77_v40, %v53_v38  ;;  %v55_v45 = vld [vmem:[#allocation2 + $0x78] sm:$0xff] }
  0x28   :  { %123 = vst [vmem:[#allocation7 + $0x58] sm:$0xff] %v99_v35  ;;  %v102_v44 = vadd.f32 %v78_v42, %v54_v41  ;;  %v79_v46 = vld [vmem:[#allocation5 + $0x78] sm:$0xff]  ;;  %v56_v47 = vld [vmem:[#allocation2 + $0x80] sm:$0xff]  ;;  %v57_v50 = vld [vmem:[#allocation2 + $0x88] sm:$0xff] }
  0x29   :  { %124 = vst [vmem:[#allocation7 + $0x60] sm:$0xff] %v100_v39  ;;  %v103_v48 = vadd.f32 %v79_v46, %v55_v45  ;;  %v80_v49 = vld [vmem:[#allocation5 + $0x80] sm:$0xff]  ;;  %v81_v51 = vld [vmem:[#allocation5 + $0x88] sm:$0xff]  ;;  %125 = vst [vmem:[#allocation7 + $0x68] sm:$0xff] %v101_v43 }
  0x2a   :  { %126 = vst [vmem:[#allocation7 + $0x70] sm:$0xff] %v102_v44  ;;  %v104_v52 = vadd.f32 %v80_v49, %v56_v47  ;;  %v105_v53 = vadd.f32 %v81_v51, %v57_v50  ;;  %v58_v54 = vld [vmem:[#allocation2 + $0x90] sm:$0xff]  ;;  %v59_v56 = vld [vmem:[#allocation2 + $0x98] sm:$0xff]  ;;  %v60_v59 = vld [vmem:[#allocation2 + $0xa0] sm:$0xff] }
  0x2b   :  { %v82_v55 = vld [vmem:[#allocation5 + $0x90] sm:$0xff]  ;;  %127 = vst [vmem:[#allocation7 + $0x78] sm:$0xff] %v103_v48  ;;  %v83_v58 = vld [vmem:[#allocation5 + $0x98] sm:$0xff]  ;;  %v84_v60 = vld [vmem:[#allocation5 + $0xa0] sm:$0xff] }
  0x2c   :  { %v106_v57 = vadd.f32 %v82_v55, %v58_v54  ;;  %128 = vst [vmem:[#allocation7 + $0x80] sm:$0xff] %v104_v52  ;;  %129 = vst [vmem:[#allocation7 + $0x88] sm:$0xff] %v105_v53  ;;  %v107_v61 = vadd.f32 %v83_v58, %v59_v56  ;;  %v108_v62 = vadd.f32 %v84_v60, %v60_v59  ;;  %v61_v63 = vld [vmem:[#allocation2 + $0xa8] sm:$0xff]  ;;  %v62_v1 = vld [vmem:[#allocation2 + $0xb0] sm:$0xff] }
  0x2d   :  { %v85_v0 = vld [vmem:[#allocation5 + $0xa8] sm:$0xff]  ;;  %v86_v3 = vld [vmem:[#allocation5 + $0xb0] sm:$0xff]  ;;  %v63_v4 = vld [vmem:[#allocation2 + $0xb8] sm:$0xff] }
  0x2e   :  { %130 = vst [vmem:[#allocation7 + $0x90] sm:$0xff] %v106_v57  ;;  %v109_v2 = vadd.f32 %v85_v0, %v61_v63  ;;  %v87_v5 = vld [vmem:[#allocation5 + $0xb8] sm:$0xff]  ;;  %131 = vst [vmem:[#allocation7 + $0x98] sm:$0xff] %v107_v61  ;;  %v110_v6 = vadd.f32 %v86_v3, %v62_v1 }
  0x2f   :  { %132 = vst [vmem:[#allocation7 + $0xa0] sm:$0xff] %v108_v62  ;;  %v111_v7 = vadd.f32 %v87_v5, %v63_v4 }
  0x30   :  { %133 = vst [vmem:[#allocation7 + $0xa8] sm:$0xff] %v109_v2  ;;  %134 = vst [vmem:[#allocation7 + $0xb0] sm:$0xff] %v110_v6 }
  0x31   :  { %135 = vst [vmem:[#allocation7 + $0xb8] sm:$0xff] %v111_v7 }
  0x32   :  { %210 = shalt.err (!%p207_p0)
}
  0x33   :  { %147 = dma.vmem_to_hbm [thread:$0]  %s142_s1, 3072, %s265_s2, [#allocation4], %s226_s12, %s226_s12, %s227_s13  }
  0x34   :  { %223 = dma.done.wait [#allocation4], 3072  }
  0x35   :  { %224 = vsyncadd [#allocation4], 4294964224 }
  0x36   :  { %151 = vsyncpa [#allocation3], 1 }
  0x37   :  { %152 = vsyncpa [#allocation6], 1 }
  0x38   :  { %153 = vsyncpa [#allocation4], 1 }

</bundles_post_ra>
